<compile_context>
chip_gen: v7x
topology: tpu7x:2x2x1
jax: 0.10.0
libtpu: 0.0.40
codegen_flags: <defaults>
</compile_context>

<pallas_src>
import functools

import jax
import jax.numpy as jnp
from jax import lax
from jax.experimental import pallas as pl
from jax.experimental.pallas import tpu as pltpu


def _focal_loss_kernel(logits_ref, target_ref, loss_ref, *, gamma: float,
                       tile_n: int, n_total: int):
    i = pl.program_id(0)

    # Single fused pass over the tile: log-softmax, one-hot gather, focal weight.
    x = logits_ref[...].astype(jnp.float32)                 # (tile_n, C) f32
    m = jnp.max(x, axis=-1, keepdims=True)                  # stable row max
    shifted = x - m
    lse = jnp.log(jnp.sum(jnp.exp(shifted), axis=-1, keepdims=True))
    logp = shifted - lse                                     # log_softmax

    tgt = target_ref[...]                                    # (tile_n, 1) int32
    col = lax.broadcasted_iota(jnp.int32, logp.shape, 1)
    onehot = col == tgt                                       # (tile_n, C) bool

    # gather(1, target).view(-1) -> per-row selected log-prob
    logpt = jnp.sum(jnp.where(onehot, logp, 0.0), axis=-1, keepdims=True)
    pt = jnp.exp(logpt)

    g = float(gamma)
    if g == 0.0:
        weight = jnp.ones_like(pt)                            # (1-pt)^0 == 1
    elif g == 2.0:
        weight = jnp.square(1.0 - pt)                         # VPU mul, no EUP pow
    elif g.is_integer() and g > 0.0:
        weight = lax.integer_pow(1.0 - pt, int(g))
    else:
        # general float pow path (exp/log on EUP); clamp for numerical safety
        weight = jnp.power(jnp.maximum(1.0 - pt, 0.0), g)

    loss = -1.0 * weight * logpt                              # (tile_n, 1)

    # Mask rows past N in the (possibly partial) last tile.
    row = lax.broadcasted_iota(jnp.int32, loss.shape, 0) + i * tile_n
    loss_ref[...] = jnp.where(row < n_total, loss, 0.0)


def _pick_tile_n(n: int, c: int, itemsize: int) -> int:
    """Tile over N: ~2 MiB logits block, sublane-aligned, never > N."""
    sub = 8 if itemsize >= 4 else 16          # f32 -> 8 rows/vreg, bf16 -> 16
    if n <= sub:
        return n                               # full-dim block (escape hatch)
    budget = 2 * 1024 * 1024                   # bytes of logits per block
    t = budget // max(1, c * itemsize)
    t = max(sub, (t // sub) * sub)
    t = min(t, (n // sub) * sub, 2048)
    return max(t, sub)


def focal_loss(logits: jax.Array, target: jax.Array, *, gamma: float = 0.0,
               reduction: str = "mean") -> jax.Array:
    """Focal loss. logits: (N, C) float (f32 or bf16), target: (N,) int.

    reduction: 'mean' | 'sum' | 'none' (matches the PyTorch module).
    """
    if reduction not in ("mean", "sum", "none"):
        raise NotImplementedError
    n, c = logits.shape
    itemsize = jnp.dtype(logits.dtype).itemsize
    tile_n = _pick_tile_n(n, c, itemsize)
    grid_n = pl.cdiv(n, tile_n)

    target2d = target.reshape(n, 1).astype(jnp.int32)

    kernel = functools.partial(_focal_loss_kernel, gamma=float(gamma),
                               tile_n=tile_n, n_total=n)

    per_row = pl.pallas_call(
        kernel,
        out_shape=jax.ShapeDtypeStruct((n, 1), jnp.float32),
        grid_spec=pltpu.PrefetchScalarGridSpec(
            num_scalar_prefetch=0,
            grid=(grid_n,),
            in_specs=[
                pl.BlockSpec((tile_n, c), lambda i: (i, 0)),   # logits tile
                pl.BlockSpec((tile_n, 1), lambda i: (i, 0)),   # targets tile
            ],
            out_specs=pl.BlockSpec((tile_n, 1), lambda i: (i, 0)),
        ),
        compiler_params=pltpu.CompilerParams(
            dimension_semantics=("parallel",),     # independent tiles (v7x 2 TCs)
            vmem_limit_bytes=32 * 1024 * 1024,     # safe on v5e/v6e/v7x
        ),
        cost_estimate=pl.CostEstimate(
            flops=int(6 * n * c),
            transcendentals=int(n * c + 2 * n),
            bytes_accessed=int(n * c * itemsize + 2 * n * 4),
        ),
    )(logits, target2d)

    if reduction == "mean":
        return jnp.mean(per_row)
    if reduction == "sum":
        return jnp.sum(per_row)
    return per_row.reshape(-1)                      # 'none'


def _focal_loss_ref(logits, target, gamma, reduction="mean"):
    logp = jax.nn.log_softmax(logits.astype(jnp.float32), axis=-1)
    logpt = jnp.take_along_axis(logp, target.reshape(-1, 1), axis=1).reshape(-1)
    pt = jnp.exp(logpt)
    loss = -1.0 * (1.0 - pt) ** gamma * logpt
    if reduction == "mean":
        return loss.mean()
    if reduction == "sum":
        return loss.sum()
    return loss


if __name__ == "__main__":
    key = jax.random.PRNGKey(0)
    k1, k2, k3, k4 = jax.random.split(key, 4)

    # Test 1: small f32, gamma=2, mean (exercises jnp.square fast path).
    N, C = 8, 32
    logits = jax.random.normal(k1, (N, C), dtype=jnp.float32)
    target = jax.random.randint(k2, (N,), 0, C, dtype=jnp.int32)

    out = jax.block_until_ready(focal_loss(logits, target, gamma=2.0,
                                           reduction="mean"))
    ref = _focal_loss_ref(logits, target, 2.0, "mean")
    assert jnp.allclose(out, ref, atol=1e-5, rtol=1e-5), (out, ref)

    # Test 2: module-default gamma=0, mean.
    out0 = jax.block_until_ready(focal_loss(logits, target, gamma=0.0,
                                            reduction="mean"))
    ref0 = _focal_loss_ref(logits, target, 0.0, "mean")
    assert jnp.allclose(out0, ref0, atol=1e-5, rtol=1e-5), (out0, ref0)

    # Test 3: N not a multiple of the tile (exercises partial-tile masking),
    # 'sum' and 'none' reductions.
    N2, C2 = 20, 160
    logits2 = jax.random.normal(k3, (N2, C2), dtype=jnp.float32)
    target2 = jax.random.randint(k4, (N2,), 0, C2, dtype=jnp.int32)
    out_sum = jax.block_until_ready(focal_loss(logits2, target2, gamma=2.0,
                                               reduction="sum"))
    ref_sum = _focal_loss_ref(logits2, target2, 2.0, "sum")
    assert jnp.allclose(out_sum, ref_sum, atol=1e-4, rtol=1e-5), (out_sum, ref_sum)
    out_none = jax.block_until_ready(focal_loss(logits2, target2, gamma=2.0,
                                                reduction="none"))
    ref_none = _focal_loss_ref(logits2, target2, 2.0, "none")
    assert jnp.allclose(out_none, ref_none, atol=1e-5, rtol=1e-5)

    # Test 4: bf16 logits pass through unchanged (halves HBM traffic); the
    # f32 upcast happens inside the kernel.
    logits_bf = logits.astype(jnp.bfloat16)
    out_bf = jax.block_until_ready(focal_loss(logits_bf, target, gamma=2.0,
                                              reduction="mean"))
    ref_bf = _focal_loss_ref(logits_bf, target, 2.0, "mean")
    assert jnp.allclose(out_bf, ref_bf, atol=1e-5, rtol=1e-5), (out_bf, ref_bf)

    print("KERNEL_OK")
</pallas_src>

<mosaic_0001>
module attributes {stable_mosaic.version = 11 : i64} {
  func.func @_focal_loss_kernel(%arg0: i32, %arg1: memref<8x32xf32, #tpu.memory_space<vmem>>, %arg2: memref<8x1xi32, #tpu.memory_space<vmem>>, %arg3: memref<8x1xf32, #tpu.memory_space<vmem>>) attributes {dimension_semantics = [#tpu.dimension_semantics<parallel>], iteration_bounds = array<i64: 1>, scalar_prefetch = 0 : i64, scratch_operands = 0 : i64, tpu.core_type = #tpu.core_type<tc>, window_params = [{transform_indices = @transform_0, window_bounds = array<i64: 8, 32>}, {transform_indices = @transform_1, window_bounds = array<i64: 8, 1>}, {transform_indices = @transform_2, window_bounds = array<i64: 8, 1>}]} {
    %c0 = arith.constant 0 : index
    %c0_0 = arith.constant 0 : index
    %0 = vector.load %arg1[%c0, %c0_0] : memref<8x32xf32, #tpu.memory_space<vmem>>, vector<8x32xf32>
    %cst = arith.constant dense<0xFF800000> : vector<8xf32>
    %1 = vector.multi_reduction <maximumf>, %0, %cst [1] : vector<8x32xf32> to vector<8xf32>
    %2 = vector.shape_cast %1 : vector<8xf32> to vector<8x1xf32>
    %3 = vector.broadcast %2 : vector<8x1xf32> to vector<8x32xf32>
    %4 = arith.subf %0, %3 : vector<8x32xf32>
    %5 = math.exp %4 : vector<8x32xf32>
    %cst_1 = arith.constant dense<0.000000e+00> : vector<8xf32>
    %6 = vector.multi_reduction <add>, %5, %cst_1 [1] : vector<8x32xf32> to vector<8xf32>
    %7 = vector.shape_cast %6 : vector<8xf32> to vector<8x1xf32>
    %8 = math.log %7 : vector<8x1xf32>
    %9 = vector.broadcast %8 : vector<8x1xf32> to vector<8x32xf32>
    %10 = arith.subf %4, %9 : vector<8x32xf32>
    %c0_2 = arith.constant 0 : index
    %c0_3 = arith.constant 0 : index
    %11 = vector.load %arg2[%c0_2, %c0_3] : memref<8x1xi32, #tpu.memory_space<vmem>>, vector<8x1xi32>
    %12 = tpu.iota {dimensions = array<i32: 1>} : vector<8x32xi32>
    %13 = vector.broadcast %11 : vector<8x1xi32> to vector<8x32xi32>
    %14 = arith.cmpi eq, %12, %13 : vector<8x32xi32>
    %cst_4 = arith.constant 0.000000e+00 : f32
    %15 = vector.broadcast %cst_4 : f32 to vector<8x32xf32>
    %16 = arith.select %14, %10, %15 : vector<8x32xi1>, vector<8x32xf32>
    %cst_5 = arith.constant dense<0.000000e+00> : vector<8xf32>
    %17 = vector.multi_reduction <add>, %16, %cst_5 [1] : vector<8x32xf32> to vector<8xf32>
    %18 = vector.shape_cast %17 : vector<8xf32> to vector<8x1xf32>
    %19 = math.exp %18 : vector<8x1xf32>
    %cst_6 = arith.constant 1.000000e+00 : f32
    %20 = vector.broadcast %cst_6 : f32 to vector<8x1xf32>
    %21 = arith.subf %20, %19 : vector<8x1xf32>
    %22 = arith.mulf %21, %21 : vector<8x1xf32>
    %cst_7 = arith.constant -1.000000e+00 : f32
    %23 = vector.broadcast %cst_7 : f32 to vector<8x1xf32>
    %24 = arith.mulf %23, %22 : vector<8x1xf32>
    %25 = arith.mulf %24, %18 : vector<8x1xf32>
    %26 = tpu.iota {dimensions = array<i32: 0>} : vector<8x1xi32>
    %c8_i32 = arith.constant 8 : i32
    %27 = arith.muli %arg0, %c8_i32 : i32
    %28 = vector.broadcast %27 : i32 to vector<8x1xi32>
    %29 = arith.addi %26, %28 : vector<8x1xi32>
    %c8_i32_8 = arith.constant 8 : i32
    %30 = vector.broadcast %c8_i32_8 : i32 to vector<8x1xi32>
    %31 = arith.cmpi slt, %29, %30 : vector<8x1xi32>
    %cst_9 = arith.constant 0.000000e+00 : f32
    %32 = vector.broadcast %cst_9 : f32 to vector<8x1xf32>
    %33 = arith.select %31, %25, %32 : vector<8x1xi1>, vector<8x1xf32>
    %c0_10 = arith.constant 0 : index
    %c0_11 = arith.constant 0 : index
    %34 = vector.load %arg3[%c0_10, %c0_11] : memref<8x1xf32, #tpu.memory_space<vmem>>, vector<8x1xf32>
    tpu.vector_store %arg3[%c0_10, %c0_11], %33 {strides = array<i32>} : memref<8x1xf32, #tpu.memory_space<vmem>>, vector<8x1xf32>,
    return
  }
  func.func @transform_0(%arg0: i32) -> (i32, i32) {
    %c0_i32 = arith.constant 0 : i32
    %c0_i32_0 = arith.constant 0 : i32
    return %arg0, %c0_i32 : i32, i32
  }
  func.func @transform_1(%arg0: i32) -> (i32, i32) {
    %c0_i32 = arith.constant 0 : i32
    %c0_i32_0 = arith.constant 0 : i32
    return %arg0, %c0_i32 : i32, i32
  }
  func.func @transform_2(%arg0: i32) -> (i32, i32) {
    %c0_i32 = arith.constant 0 : i32
    %c0_i32_0 = arith.constant 0 : i32
    return %arg0, %c0_i32 : i32, i32
  }
}

</mosaic_0001>

<bundles_post_ra>
// kernel: tpu_custom_call.1
= control target key start
LH: loop header
LB: loop body
LE: loop exit
PB: predicated region body
PF: predicated region fallthrough
CT: control target
= control target key end

     0   :  { %vm12_vm0 = vcmask 261120   ;;  %v64_v2 = vmov 0   ;;  %v26_v10 = vlaneseq  ;;  %vm49_vm2 = vcmask 7168   ;;  %s92_s0 = inlined_call_operand.vmem [shape: f32[8,32], index: 0, kind: input, shape index: {}]   ;;  %s93_s1 = inlined_call_operand.vmem [shape: s32[8,1], index: 1, kind: input, shape index: {}]   ;;  %s94_s2 = inlined_call_operand.vmem [shape: f32[8,1], index: 2, kind: output, shape index: {}]  }
   0x1   :  { %v11_v0 = vld [vmem:[%s92_s0] sm:$0xff]  ;;  %56 = vset.pattern.permute.xlu1 %v64_v2  ;;  %57 = vset.pattern.permute.xlu0 %v64_v2 }
   0x2   :  { %v13_v1 = vsel %vm12_vm0, %v11_v0, -inf  ;;  %v25_v3 = vld [vmem:[%s93_s1] sm:$0xff]  ;;  %v27_v11 = vand.u32 127, %v26_v10 }
   0x3   :  { %14 = vmax.xlane.f32.xlu0 %v13_v1  ;;  %29 = vperm.xlu1 %56, %v25_v3  }
  0x82   :  { %v30_v12 = vpop.permute.xlu1 %29 }
  0x83   :  { %vm31_vm1 = vcmp.eq.s32.totalorder %v27_v11, %v30_v12 }
  0x90   :  { %v15_v4 = vpop.xlane.xlu0 %14 }
  0x91   :  { %v16_v5 = vsub.f32 %v11_v0, %v15_v4 }
  0x93   :  { %v17_v6 = vmul.f32 1.442695, %v16_v5 }
  0x95   :  { %58 = vpow2.f32 %v17_v6 }
  0x9f   :  { %v59_v7 = vpop.eup %58 }
  0xa0   :  { %v19_v8 = vsel %vm12_vm0, %v59_v7, 0.0 }
  0xa1   :  { %20 = vadd.xlane.f32.xlu0 %v19_v8 }
 0x12e   :  { %v21_v9 = vpop.xlane.xlu0 %20 }
 0x12f   :  { %60 = vlog2.f32 %v21_v9 }
 0x139   :  { %v61_v13 = vpop.eup %60 }
 0x13a   :  { %v23_v14 = vmul.f32 0.6931472, %v61_v13 }
 0x13c   :  { %v24_v15 = vsub.f32 %v16_v5, %v23_v14 }
 0x13e   :  { %v32_v16 = vsel %vm31_vm1, %v24_v15, 0.0 }
 0x13f   :  { %v33_v17 = vsel %vm12_vm0, %v32_v16, 0.0 }
 0x140   :  { %34 = vadd.xlane.f32.xlu1 %v33_v17 }
 0x1cd   :  { %v35_v18 = vpop.xlane.xlu1 %34 }
 0x1ce   :  { %v36_v19 = vmul.f32 1.442695, %v35_v18 }
 0x1d0   :  { %62 = vpow2.f32 %v36_v19 }
 0x1da   :  { %v63_v20 = vpop.eup %62 }
 0x1db   :  { %v38_v21 = vsub.f32 1.0, %v63_v20 }
 0x1dd   :  { %v39_v22 = vmul.f32 %v38_v21, %v38_v21 }
 0x1df   :  { %v40_v23 = vmul.f32 -1.0, %v39_v22 }
 0x1e1   :  { %v41_v24 = vmul.f32 %v40_v23, %v35_v18 }
 0x1e3   :  { %50 = vst.msk [vmem:[%s94_s2] sm:$0xff] %vm49_vm2, %v41_v24 }

</bundles_post_ra>
